<compile_context>
chip_gen: v7x
topology: tpu7x:2x2x1
jax: 0.10.0
libtpu: 0.0.40
codegen_flags: <defaults>
</compile_context>

<pallas_src>
import functools

import jax
import jax.numpy as jnp
from jax.experimental import pallas as pl
from jax.experimental.pallas import tpu as pltpu

_LANE = 128
_TB = 512        # batch tile (rows) for the pipelined large-batch path
_SMALL_B = 512   # at or below this, a single un-gridded block is cheaper


def _round_up(n, m):
    return ((n + m - 1) // m) * m


def policy_kernel(x_ref, w1_ref, b1_ref, w2_ref, b2_ref, w3_ref, b3_ref, out_ref):
    """Fused (conv-as-dense) -> tanh -> dense -> tanh -> dense -> softmax.

    x_ref : (TB, Kp)  bf16, Kp = round_up(state_dim*25, 128), zero padded
    w1_ref: (Kp, 32)  bf16 conv weights (transposed, zero padded rows)
    b1_ref: (1, 32)   f32
    w2_ref: (32, 16)  f32
    b2_ref: (1, 16)   f32
    w3_ref: (16, Ap)  f32, Ap = round_up(action_dim, 128), zero padded cols
    b3_ref: (1, Ap)   f32, padded entries = -1e30 (vanish in softmax)
    out_ref: (TB, Ap) f32 softmax probabilities (real probs in [:, :A])
    """
    # Layer 1: 5x5 conv over a 5x5 input == dense over C*25 features.
    # bf16 inputs, f32 MXU accumulation.  Dropout(0.2) is identity (eval).
    h1 = jnp.tanh(
        jnp.dot(x_ref[...], w1_ref[...], preferred_element_type=jnp.float32)
        + b1_ref[...]
    )
    # Layer 2: Flatten is a no-op; Linear(32, 16) + Tanh in f32.
    h2 = jnp.tanh(
        jnp.dot(h1, w2_ref[...], preferred_element_type=jnp.float32) + b2_ref[...]
    )
    # Layer 3: Linear(16, A) padded to 128 lanes + Softmax(dim=1).
    logits = (
        jnp.dot(h2, w3_ref[...], preferred_element_type=jnp.float32) + b3_ref[...]
    )
    m = jnp.max(logits, axis=-1, keepdims=True)
    e = jnp.exp(logits - m)
    out_ref[...] = e / jnp.sum(e, axis=-1, keepdims=True)


@functools.partial(jax.jit, static_argnames=("action_dim",))
def policy_forward(x_nchw, packed_params, action_dim):
    """x_nchw: (B, state_dim, 5, 5) f32 -> (B, action_dim) probabilities."""
    w1, b1, w2, b2, w3, b3 = packed_params
    B, C, H, W = x_nchw.shape
    K = C * H * W
    Kp = w1.shape[0]
    Ap = w3.shape[1]

    # Flatten NCHW exactly the way the 5x5 conv consumes it (matches the
    # row-major flattening of the (32, C, 5, 5) conv weight).
    x_flat = x_nchw.reshape(B, K)

    vmem = pltpu.MemorySpace.VMEM

    if B <= _SMALL_B:
        # Tiny batch: one block, no grid / per-step overhead.
        x_pad = jnp.pad(x_flat, ((0, 0), (0, Kp - K))).astype(jnp.bfloat16)
        out = pl.pallas_call(
            policy_kernel,
            out_shape=jax.ShapeDtypeStruct((B, Ap), jnp.float32),
            in_specs=[pl.BlockSpec(memory_space=vmem)] * 7,
            out_specs=pl.BlockSpec(memory_space=vmem),
            compiler_params=pltpu.CompilerParams(vmem_limit_bytes=32 * 1024 * 1024),
        )(x_pad, w1, b1, w2, b2, w3, b3)
        return out[:, :action_dim]

    # Large batch: tile over rows so Pallas double-buffers the x DMA behind the
    # matmul; "parallel" batch axis shards the grid over both TCs on v7x.
    Bp = _round_up(B, _TB)
    x_pad = jnp.pad(x_flat, ((0, Bp - B), (0, Kp - K))).astype(jnp.bfloat16)
    out = pl.pallas_call(
        policy_kernel,
        out_shape=jax.ShapeDtypeStruct((Bp, Ap), jnp.float32),
        grid=(Bp // _TB,),
        in_specs=[
            pl.BlockSpec((_TB, Kp), lambda i: (i, 0)),   # x tile: pipelined
            pl.BlockSpec((Kp, 32), lambda i: (0, 0)),    # weights: resident
            pl.BlockSpec((1, 32), lambda i: (0, 0)),
            pl.BlockSpec((32, 16), lambda i: (0, 0)),
            pl.BlockSpec((1, 16), lambda i: (0, 0)),
            pl.BlockSpec((16, Ap), lambda i: (0, 0)),
            pl.BlockSpec((1, Ap), lambda i: (0, 0)),
        ],
        out_specs=pl.BlockSpec((_TB, Ap), lambda i: (i, 0)),
        compiler_params=pltpu.CompilerParams(
            dimension_semantics=("parallel",),
            vmem_limit_bytes=32 * 1024 * 1024,
        ),
    )(x_pad, w1, b1, w2, b2, w3, b3)
    return out[:B, :action_dim]


def init_raw_params(key, state_dim, action_dim):
    """Parameters in the original PyTorch layouts."""
    k = jax.random.split(key, 6)
    conv_w = jax.random.normal(k[0], (32, state_dim, 5, 5), jnp.float32) * 0.1
    conv_b = jax.random.normal(k[1], (32,), jnp.float32) * 0.1
    fc1_w = jax.random.normal(k[2], (16, 32), jnp.float32) * 0.1   # (out, in)
    fc1_b = jax.random.normal(k[3], (16,), jnp.float32) * 0.1
    fc2_w = jax.random.normal(k[4], (action_dim, 16), jnp.float32) * 0.1
    fc2_b = jax.random.normal(k[5], (action_dim,), jnp.float32) * 0.1
    return (conv_w, conv_b, fc1_w, fc1_b, fc2_w, fc2_b)


def pack_params(raw_params, action_dim):
    """Transpose / pad / cast the PyTorch-layout params into kernel layout."""
    conv_w, conv_b, fc1_w, fc1_b, fc2_w, fc2_b = raw_params
    K = conv_w.shape[1] * conv_w.shape[2] * conv_w.shape[3]
    Kp = _round_up(K, _LANE)
    Ap = _round_up(action_dim, _LANE)

    w1 = conv_w.reshape(32, K).T                                   # (K, 32)
    w1 = jnp.pad(w1, ((0, Kp - K), (0, 0))).astype(jnp.bfloat16)   # (Kp, 32) bf16
    b1 = conv_b.reshape(1, 32).astype(jnp.float32)
    w2 = fc1_w.T.astype(jnp.float32)                               # (32, 16)
    b2 = fc1_b.reshape(1, 16).astype(jnp.float32)
    w3 = jnp.pad(fc2_w.T, ((0, 0), (0, Ap - action_dim))).astype(jnp.float32)
    b3 = jnp.pad(fc2_b.reshape(1, -1), ((0, 0), (0, Ap - action_dim)),
                 constant_values=-1e30).astype(jnp.float32)
    return (w1, b1, w2, b2, w3, b3)


def policy_reference(x_nchw, raw_params, action_dim):
    """Pure-JAX f32 reference of the collapsed network (eval mode)."""
    conv_w, conv_b, fc1_w, fc1_b, fc2_w, fc2_b = raw_params
    B = x_nchw.shape[0]
    x_flat = x_nchw.reshape(B, -1)
    h1 = jnp.tanh(x_flat @ conv_w.reshape(32, -1).T + conv_b[None, :])
    h2 = jnp.tanh(h1 @ fc1_w.T + fc1_b[None, :])
    logits = h2 @ fc2_w.T + fc2_b[None, :]
    return jax.nn.softmax(logits, axis=1)


if __name__ == "__main__":
    state_dim, action_dim = 4, 6

    key = jax.random.PRNGKey(0)
    kx, kp, kx2 = jax.random.split(key, 3)

    raw = init_raw_params(kp, state_dim, action_dim)
    packed = pack_params(raw, action_dim)

    # Small-batch path (B=2): single un-gridded block.
    x_small = jax.random.normal(kx, (2, state_dim, 5, 5), jnp.float32)
    p_small = jax.block_until_ready(policy_forward(x_small, packed, action_dim))
    assert p_small.shape == (2, action_dim)
    assert jnp.allclose(jnp.sum(p_small, axis=1), 1.0, atol=1e-5)
    ref_small = policy_reference(x_small, raw, action_dim)
    assert jnp.allclose(p_small, ref_small, atol=2e-2), \
        float(jnp.max(jnp.abs(p_small - ref_small)))

    # Large-batch path (B=1024): batch-tiled, pipelined, parallel grid.
    x_big = jax.random.normal(kx2, (1024, state_dim, 5, 5), jnp.float32)
    p_big = jax.block_until_ready(policy_forward(x_big, packed, action_dim))
    assert p_big.shape == (1024, action_dim)
    assert jnp.allclose(jnp.sum(p_big, axis=1), 1.0, atol=1e-5)
    ref_big = policy_reference(x_big, raw, action_dim)
    assert jnp.allclose(p_big, ref_big, atol=2e-2), \
        float(jnp.max(jnp.abs(p_big - ref_big)))

    print("KERNEL_OK")
</pallas_src>

<mosaic_0001>
module attributes {stable_mosaic.version = 11 : i64} {
  func.func @policy_kernel(%arg0: memref<2x128xbf16, #tpu.memory_space<vmem>>, %arg1: memref<128x32xbf16, #tpu.memory_space<vmem>>, %arg2: memref<1x32xf32, #tpu.memory_space<vmem>>, %arg3: memref<32x16xf32, #tpu.memory_space<vmem>>, %arg4: memref<1x16xf32, #tpu.memory_space<vmem>>, %arg5: memref<16x128xf32, #tpu.memory_space<vmem>>, %arg6: memref<1x128xf32, #tpu.memory_space<vmem>>, %arg7: memref<2x128xf32, #tpu.memory_space<vmem>>) attributes {dimension_semantics = [], scalar_prefetch = 0 : i64, scratch_operands = 0 : i64, tpu.core_type = #tpu.core_type<tc>} {
    %c0 = arith.constant 0 : index
    %c0_0 = arith.constant 0 : index
    %0 = vector.load %arg0[%c0, %c0_0] : memref<2x128xbf16, #tpu.memory_space<vmem>>, vector<2x128xbf16>
    %c0_1 = arith.constant 0 : index
    %c0_2 = arith.constant 0 : index
    %1 = vector.load %arg1[%c0_1, %c0_2] : memref<128x32xbf16, #tpu.memory_space<vmem>>, vector<128x32xbf16>
    %cst = arith.constant dense<0.000000e+00> : vector<2x32xf32>
    %2 = tpu.matmul %0, %1, %cst {dimension_numbers = #tpu.dot_dimension_numbers<[1], [0], [0], [1], [0, 0, 1, 1], [], []>} : vector<2x128xbf16>, vector<128x32xbf16>, vector<2x32xf32> -> vector<2x32xf32>
    %c0_3 = arith.constant 0 : index
    %c0_4 = arith.constant 0 : index
    %3 = vector.load %arg2[%c0_3, %c0_4] : memref<1x32xf32, #tpu.memory_space<vmem>>, vector<1x32xf32>
    %4 = vector.broadcast %3 : vector<1x32xf32> to vector<2x32xf32>
    %5 = arith.addf %2, %4 : vector<2x32xf32>
    %6 = math.tanh %5 : vector<2x32xf32>
    %c0_5 = arith.constant 0 : index
    %c0_6 = arith.constant 0 : index
    %7 = vector.load %arg3[%c0_5, %c0_6] : memref<32x16xf32, #tpu.memory_space<vmem>>, vector<32x16xf32>
    %cst_7 = arith.constant dense<0.000000e+00> : vector<2x16xf32>
    %8 = tpu.matmul %6, %7, %cst_7 {dimension_numbers = #tpu.dot_dimension_numbers<[1], [0], [0], [1], [0, 0, 1, 1], [], []>} : vector<2x32xf32>, vector<32x16xf32>, vector<2x16xf32> -> vector<2x16xf32>
    %c0_8 = arith.constant 0 : index
    %c0_9 = arith.constant 0 : index
    %9 = vector.load %arg4[%c0_8, %c0_9] : memref<1x16xf32, #tpu.memory_space<vmem>>, vector<1x16xf32>
    %10 = vector.broadcast %9 : vector<1x16xf32> to vector<2x16xf32>
    %11 = arith.addf %8, %10 : vector<2x16xf32>
    %12 = math.tanh %11 : vector<2x16xf32>
    %c0_10 = arith.constant 0 : index
    %c0_11 = arith.constant 0 : index
    %13 = vector.load %arg5[%c0_10, %c0_11] : memref<16x128xf32, #tpu.memory_space<vmem>>, vector<16x128xf32>
    %cst_12 = arith.constant dense<0.000000e+00> : vector<2x128xf32>
    %14 = tpu.matmul %12, %13, %cst_12 {dimension_numbers = #tpu.dot_dimension_numbers<[1], [0], [0], [1], [0, 0, 1, 1], [], []>} : vector<2x16xf32>, vector<16x128xf32>, vector<2x128xf32> -> vector<2x128xf32>
    %c0_13 = arith.constant 0 : index
    %c0_14 = arith.constant 0 : index
    %15 = vector.load %arg6[%c0_13, %c0_14] : memref<1x128xf32, #tpu.memory_space<vmem>>, vector<1x128xf32>
    %16 = vector.broadcast %15 : vector<1x128xf32> to vector<2x128xf32>
    %17 = arith.addf %14, %16 : vector<2x128xf32>
    %cst_15 = arith.constant dense<0xFF800000> : vector<2xf32>
    %18 = vector.multi_reduction <maximumf>, %17, %cst_15 [1] : vector<2x128xf32> to vector<2xf32>
    %19 = vector.shape_cast %18 : vector<2xf32> to vector<2x1xf32>
    %20 = vector.broadcast %19 : vector<2x1xf32> to vector<2x128xf32>
    %21 = arith.subf %17, %20 : vector<2x128xf32>
    %22 = math.exp %21 : vector<2x128xf32>
    %cst_16 = arith.constant dense<0.000000e+00> : vector<2xf32>
    %23 = vector.multi_reduction <add>, %22, %cst_16 [1] : vector<2x128xf32> to vector<2xf32>
    %24 = vector.shape_cast %23 : vector<2xf32> to vector<2x1xf32>
    %25 = vector.broadcast %24 : vector<2x1xf32> to vector<2x128xf32>
    %26 = arith.divf %22, %25 : vector<2x128xf32>
    %c0_17 = arith.constant 0 : index
    %c0_18 = arith.constant 0 : index
    %27 = vector.load %arg7[%c0_17, %c0_18] : memref<2x128xf32, #tpu.memory_space<vmem>>, vector<2x128xf32>
    tpu.vector_store %arg7[%c0_17, %c0_18], %26 {strides = array<i32>} : memref<2x128xf32, #tpu.memory_space<vmem>>, vector<2x128xf32>,
    return
  }
}

</mosaic_0001>

<bundles_post_ra>
// kernel: policy_forward.1
= control target key start
LH: loop header
LB: loop body
LE: loop exit
PB: predicated region body
PF: predicated region fallthrough
CT: control target
= control target key end

     0   :  { %v458_v1 = vmov 0.0   ;;  %vm459_vm0 = vmmov 0   ;;  %s571_s0 = inlined_call_operand.vmem [shape: bf16[2,128], index: 0, kind: input, shape index: {}]   ;;  %s572_s1 = inlined_call_operand.vmem [shape: bf16[128,32], index: 1, kind: input, shape index: {}]   ;;  %s573_s2 = inlined_call_operand.vmem [shape: f32[1,32], index: 2, kind: input, shape index: {}]   ;;  %s574_s3 = inlined_call_operand.vmem [shape: f32[32,16], index: 3, kind: input, shape index: {}]   ;;  %s575_s4 = inlined_call_operand.vmem [shape: f32[1,16], index: 4, kind: input, shape index: {}]   ;;  %s576_s5 = inlined_call_operand.vmem [shape: f32[16,128], index: 5, kind: input, shape index: {}]   ;;  %s577_s6 = inlined_call_operand.vmem [shape: f32[1,128], index: 6, kind: input, shape index: {}]   ;;  %s578_s7 = inlined_call_operand.hbm [shape: f32[2,128], index: 7, kind: output, shape index: {}]  }
   0x1   :  { %v418_v0 = vld [vmem:[%s572_s1] sm:$0xff]   ;;  %367 = vmatprep.subr.bf16.mxu0 %v458_v1  ;;  %v419_v2 = vld [vmem:[%s572_s1 + $0x8] sm:$0xff]   ;;  %383 = vmatprep.mubr.msk.bf16.mxu0 %vm459_vm0, %v458_v1  ;;  %v420_v3 = vld [vmem:[%s572_s1 + $0x10] sm:$0xff]  }
   0x2   :  { %368 = vmatpush3.bf16.msra.mxu0 %v418_v0  ;;  %395 = vmatprep.mubr.msk.f32.mxu1 %vm459_vm0, %v458_v1 }
   0x3   :  { %369 = vmatprep.subr.bf16.mxu0 %v458_v1 }
   0x6   :  { %370 = vmatpush3.bf16.msra.mxu0 %v419_v2 }
   0x7   :  { %371 = vmatprep.subr.bf16.mxu0 %v458_v1 }
   0x8   :  { %12 = vsyncpa [#allocation3], 0  ;;  %v421_v4 = vld [vmem:[%s572_s1 + $0x18] sm:$0xff]   ;;  %v422_v5 = vld [vmem:[%s572_s1 + $0x20] sm:$0xff]   ;;  %v460_v13 = vmov 0.0|0.0   ;;  %vm152_vm1 = vcmask 261120  }
   0x9   :  { %v423_v6 = vld [vmem:[%s572_s1 + $0x28] sm:$0xff]   ;;  %v424_v7 = vld [vmem:[%s572_s1 + $0x30] sm:$0xff]   ;;  %v425_v8 = vld [vmem:[%s572_s1 + $0x38] sm:$0xff]   ;;  %405 = vmatprep.subr.bf16.mxu1 %v460_v13  ;;  %vm236_vm2 = vcmask 130048   ;;  %vm310_vm3 = vcmask 1041408  }
   0xa   :  { %372 = vmatpush3.bf16.msra.mxu0 %v420_v3  ;;  %v28_v9 = vld [vmem:[%s571_s0] sm:$0x1]  ;;  %v142_v11 = vld [vmem:[%s574_s3 + $0x8] sm:$0xff]  ;;  %v143_v12 = vld [vmem:[%s574_s3 + $0x10] sm:$0xff] }
   0xb   :  { %373 = vmatprep.subr.bf16.mxu0 %v458_v1  ;;  %v141_v10 = vld [vmem:[%s574_s3] sm:$0xff]  ;;  %v144_v15 = vld [vmem:[%s574_s3 + $0x18] sm:$0xff]  ;;  %v228_v25 = vld [vmem:[%s576_s5 + $0x8] sm:$0xff] }
   0xc   :  { %v406_v14 = vpack.c.bf16 %v142_v11, %v141_v10  ;;  %v409_v16 = vpack.c.bf16 %v144_v15, %v143_v12  ;;  %v337_v17 = vld [vmem:[%s573_s2] ss:$0 sm:$0xff] }
   0xd   :  { %v227_v24 = vld [vmem:[%s576_s5] sm:$0xff] }
   0xe   :  { %374 = vmatpush3.bf16.msra.mxu0 %v421_v4  ;;  %407 = vmatpush3.bf16.msra.mxu1 %v406_v14  ;;  %v412_v26 = vpack.c.bf16 %v228_v25, %v227_v24  ;;  %v346_v27 = vld [vmem:[%s575_s4] ss:$0 sm:$0xff]  ;;  %s461_s4 = smov [#allocation2]  }
   0xf   :  { %375 = vmatprep.subr.bf16.mxu0 %v458_v1  ;;  %408 = vmatprep.subr.bf16.mxu1 %v460_v13  ;;  %v348_v32 = vld [vmem:[%s577_s6] ss:$0 sm:$0xff]  ;;  %s329_s5 = sshll.u32 %s461_s4, 4  ;;  %s330_s5 = int_to_ptr.vmem [resolvable:$true] %s329_s5 }
  0x10   :  { %s434_s6 = scalar_lea.vmem %s330_s5, 32  ;;  %p439_p1 = scmp.lt.s32.totalorder %s330_s5, %s330_s5 }
  0x11   :  { %p435_p0 = scmp.ne.s32.totalorder %s330_s5, %s434_s6  ;;  %p440_p2 = scmp.lt.s32.totalorder %s434_s6, %s434_s6 }
  0x12   :  { %376 = vmatpush3.bf16.msra.mxu0 %v422_v5  ;;  %410 = vmatpush3.bf16.msra.mxu1 %v409_v16 }
  0x13   :  { %377 = vmatprep.subr.bf16.mxu0 %v458_v1  ;;  %411 = vmatprep.subr.bf16.mxu1 %v460_v13  ;;  %p441_p3 = por %p440_p2, %p439_p1 }
  0x15   :  { %p442_p4 = pnand %p441_p3, %p435_p0 }
  0x16   :  { %378 = vmatpush3.bf16.msra.mxu0 %v423_v6 }
  0x17   :  { %379 = vmatprep.subr.bf16.mxu0 %v458_v1 }
  0x1a   :  { %380 = vmatpush3.bf16.msra.mxu0 %v424_v7 }
  0x1b   :  { %381 = vmatprep.subr.bf16.mxu0 %v458_v1 }
  0x1e   :  { %382 = vmatpush3.bf16.msra.mxu0 %v425_v8 }
  0x21   :  { %384 = vmatmul.mubr.bf16.vlgmr.msra.gmra.mrb[0].mxu0 %v28_v9 }
  0xf4   :  { %v134_v18 = vpop.f32.mrb[0].mxu0 }
  0xf5   :  { %v135_v19 = vadd.f32 %v337_v17, %v134_v18  ;;  %v385_v20 = vpop.f32.mrb[1].mxu0 }
  0xf6   :  { %v137_v21 = vpop.f32.mrb[2].mxu0 }
  0xf7   :  { %426 = vtanh.f32 %v135_v19  ;;  %v386_v22 = vpop.f32.mrb[3].mxu0 }
 0x101   :  { %v427_v23 = vpop.eup %426 }
 0x102   :  { %396 = vmatmul.mubr.msk.f32.vlgmr.msra.gmra.mrb[0].mxu1 %vm152_vm1, %v427_v23 }
 0x103   :  { %402 = vmatprep.mubr.msk.f32.mxu1 %vm459_vm0, %v458_v1  ;;  %413 = vmatpush3.bf16.msra.mxu1 %v412_v26 }
 0x1d5   :  { %v222_v28 = vpop.f32.mrb[0].mxu1 }
 0x1d6   :  { %v223_v29 = vadd.f32 %v346_v27, %v222_v28  ;;  %v397_v30 = vpop.f32.mrb[1].mxu1 }
 0x1d8   :  { %428 = vtanh.f32 %v223_v29 }
 0x1e2   :  { %v429_v31 = vpop.eup %428 }
 0x1e3   :  { %403 = vmatmul.mubr.msk.f32.vlgmr.msra.gmra.mrb[2].mxu1 %vm236_vm2, %v429_v31 }
 0x2b6   :  { %v306_v33 = vpop.f32.mrb[2].mxu1 }
 0x2b7   :  { %v307_v34 = vadd.f32 %v348_v32, %v306_v33  ;;  %v404_v35 = vpop.f32.mrb[3].mxu1 }
 0x2b9   :  { %v311_v36 = vsel %vm310_vm3, %v307_v34, -inf }
 0x2ba   :  { %312 = vmax.xlane.f32.xlu0 %v311_v36 }
 0x347   :  { %v313_v37 = vpop.xlane.xlu0 %312 }
 0x348   :  { %v314_v38 = vsub.f32 %v307_v34, %v313_v37 }
 0x34a   :  { %v315_v39 = vmul.f32 1.442695, %v314_v38 }
 0x34c   :  { %430 = vpow2.f32 %v315_v39 }
 0x356   :  { %v431_v40 = vpop.eup %430 }
 0x357   :  { %v317_v41 = vsel %vm310_vm3, %v431_v40, 0.0 }
 0x358   :  { %318 = vadd.xlane.f32.xlu0 %v317_v41 }
 0x3e5   :  { %v319_v42 = vpop.xlane.xlu0 %318 }
 0x3e6   :  { %432 = vrcp.f32 %v319_v42 }
 0x3f0   :  { %v433_v43 = vpop.eup %432 }
 0x3f1   :  { %v321_v44 = vmul.f32 %v433_v43, %v431_v40 }
 0x3f3   :  { %322 = vst [vmem:[#allocation2] sm:$0x3] %v321_v44 }
 0x3f4   :  { %445 = shalt.err (!%p442_p4)
}
 0x3f5   :  { %s446_s12 = scalar_lea.hbm %s578_s7, 32 }
 0x3f6   :  { %p447_p5 = scmp.ne.s32.totalorder %s578_s7, %s446_s12  ;;  %p450_p6 = scmp.lt.u32.totalorder %s446_s12, %s578_s7 }
 0x3f8   :  { %p452_p7 = pnand %p450_p6, %p447_p5 }
 0x3fa   :  { %455 = shalt.err (!%p452_p7)
}
 0x3fb   :  { %332 = dma.vmem_to_hbm [thread:$0]  %s330_s5, 32, %s578_s7, [#allocation3]  }
 0x3fc   :  { %456 = dma.done.wait [#allocation3], 32  }
 0x3fd   :  { %457 = vsyncadd [#allocation3], 4294967264 }
 0x3fe   :  { %336 = vsyncpa [#allocation3], 1 }

</bundles_post_ra>
